<compile_context>
chip_gen: v6e
topology: v6e:2x2x1
jax: 0.10.0
libtpu: 0.0.40
codegen_flags: <defaults>
</compile_context>

<pallas_src>
import jax
import jax.numpy as jnp
from jax.experimental import pallas as pl
from jax.experimental.pallas import tpu as pltpu


def mlp_kernel(x_ref, w1_ref, b1_ref, w2_ref, b2_ref, w3_ref, wd_ref, bf_ref,
               o_ref):
    # Feature-major: x is (in_dim, bm); every op is column (= lane) independent.
    x = x_ref[...]

    # layer 0: Linear + ReLU
    h = jnp.dot(w1_ref[...], x, preferred_element_type=jnp.float32) + b1_ref[...]
    h = jnp.maximum(h, 0.0)

    # layer 1: Linear + ReLU
    h = jnp.dot(w2_ref[...], h, preferred_element_type=jnp.float32) + b2_ref[...]
    h = jnp.maximum(h, 0.0)

    # epilogue: final Linear + down-sample residual, biases pre-folded.
    o_ref[...] = (
        jnp.dot(w3_ref[...], h, preferred_element_type=jnp.float32)
        + jnp.dot(wd_ref[...], x, preferred_element_type=jnp.float32)
        + bf_ref[...]
    )


def prepare_params(w1, b1, w2, b2, w3, b3, wd, bd):
    """One-time parameter prep (do NOT call per forward).

    Weights stay in native PyTorch [out_features, in_features] layout; biases
    become column vectors (out_features, 1); the final-layer and down-sample
    biases are folded into a single b_f = b3 + bd.
    """
    col = lambda b: jnp.asarray(b, jnp.float32).reshape(-1, 1)
    return (
        jnp.asarray(w1, jnp.float32), col(b1),
        jnp.asarray(w2, jnp.float32), col(b2),
        jnp.asarray(w3, jnp.float32),
        jnp.asarray(wd, jnp.float32),
        col(b3) + col(bd),
    )


def _round_up(v, m):
    return ((v + m - 1) // m) * m


def mlp_forward_fm(x_fm, kparams, *, batch_block=8192):
    """Feature-major forward: x_fm is (in_dim, batch) -> (out_dim, batch)."""
    w1, b1, w2, b2, w3, wd, bf = kparams
    in_dim, batch = x_fm.shape
    out_dim = w3.shape[0]

    # Lane axis (last dim) of a block must be a multiple of 128 or full extent.
    batch_block = max(128, (batch_block // 128) * 128)
    if batch <= 128:
        bm = batch  # single block == full array extent
    else:
        # >= 2 grid steps so both v7x TensorCores get work; cap at batch_block.
        bm = min(batch_block, _round_up(pl.cdiv(batch, 2), 128))
    grid = (pl.cdiv(batch, bm),)

    # Weights / biases: constant index_map -> resident across all grid steps.
    const_spec = lambda arr: pl.BlockSpec(arr.shape, lambda i: (0, 0))

    return pl.pallas_call(
        mlp_kernel,
        out_shape=jax.ShapeDtypeStruct((out_dim, batch), jnp.float32),
        grid=grid,
        in_specs=[
            pl.BlockSpec((in_dim, bm), lambda i: (0, i)),  # x: tiled over lanes
            const_spec(w1), const_spec(b1),
            const_spec(w2), const_spec(b2),
            const_spec(w3), const_spec(wd), const_spec(bf),
        ],
        out_specs=pl.BlockSpec((out_dim, bm), lambda i: (0, i)),
        compiler_params=pltpu.CompilerParams(
            dimension_semantics=("parallel",)),
    )(x_fm, w1, b1, w2, b2, w3, wd, bf)


def mlp_forward(x, kparams, *, batch_block=8192):
    """Drop-in [batch, in_features] -> [batch, out_features] wrapper.

    The boundary transposes are layout plumbing; all compute runs lane-dense
    inside the kernel.
    """
    return mlp_forward_fm(x.T, kparams, batch_block=batch_block).T


def reference_forward(x, raw_params):
    # Pure-JAX reference matching the PyTorch module (W: (out, in), b: (out,)).
    (w1, b1, w2, b2, w3, b3, wd, bd) = raw_params
    h = jnp.maximum(x @ w1.T + b1, 0.0)
    h = jnp.maximum(h @ w2.T + b2, 0.0)
    return (h @ w3.T + b3) + (x @ wd.T + bd)


if __name__ == "__main__":
    # Module config (args): num_layer=3, latent_shape=[32, 32],
    # activation='relu', down_sample=True.
    # input_shape=16 features, output_shape=8 features.
    key = jax.random.PRNGKey(0)
    ks = jax.random.split(key, 9)

    in_dim, h1, h2, out_dim = 16, 32, 32, 8

    def init_linear(kw, kb, fan_in, fan_out):
        # PyTorch-style init and layout: W is (out, in), b is (out,).
        bound = 1.0 / jnp.sqrt(jnp.float32(fan_in))
        w = jax.random.uniform(kw, (fan_out, fan_in), jnp.float32, -bound, bound)
        b = jax.random.uniform(kb, (fan_out,), jnp.float32, -bound, bound)
        return w, b

    w1, b1 = init_linear(ks[0], ks[1], in_dim, h1)
    w2, b2 = init_linear(ks[2], ks[3], h1, h2)
    w3, b3 = init_linear(ks[4], ks[5], h2, out_dim)
    wd, bd = init_linear(ks[6], ks[7], in_dim, out_dim)
    raw_params = (w1, b1, w2, b2, w3, b3, wd, bd)
    kparams = prepare_params(*raw_params)   # one-time prep (b_f folded)

    def check(batch, batch_block=8192):
        xk = jax.random.fold_in(ks[8], batch)
        x = jax.random.normal(xk, (batch, in_dim), jnp.float32)
        out = jax.block_until_ready(
            mlp_forward(x, kparams, batch_block=batch_block))
        ref = reference_forward(x, raw_params)
        assert out.shape == (batch, out_dim), out.shape
        assert jnp.allclose(out, ref, atol=1e-4, rtol=1e-4), \
            float(jnp.max(jnp.abs(out - ref)))

    check(8)      # single block (batch <= 128, full-extent lane dim)
    check(256)    # 2 x 128-lane blocks -> both v7x TensorCores busy
    check(200)    # ragged batch: masked edge block, no wrapper pad/slice
    print("KERNEL_OK")
</pallas_src>

<mosaic_0001>
module attributes {stable_mosaic.version = 11 : i64} {
  func.func @mlp_kernel(%arg0: i32, %arg1: memref<16x8xf32, #tpu.memory_space<vmem>>, %arg2: memref<32x16xf32, #tpu.memory_space<vmem>>, %arg3: memref<32x1xf32, #tpu.memory_space<vmem>>, %arg4: memref<32x32xf32, #tpu.memory_space<vmem>>, %arg5: memref<32x1xf32, #tpu.memory_space<vmem>>, %arg6: memref<8x32xf32, #tpu.memory_space<vmem>>, %arg7: memref<8x16xf32, #tpu.memory_space<vmem>>, %arg8: memref<8x1xf32, #tpu.memory_space<vmem>>, %arg9: memref<8x8xf32, #tpu.memory_space<vmem>>) attributes {dimension_semantics = [#tpu.dimension_semantics<parallel>], iteration_bounds = array<i64: 1>, scalar_prefetch = 0 : i64, scratch_operands = 0 : i64, tpu.core_type = #tpu.core_type<tc>, window_params = [{transform_indices = @transform_0, window_bounds = array<i64: 16, 8>}, {pipeline_mode = #tpu.pipeline_mode<synchronous>, transform_indices = @transform_1, window_bounds = array<i64: 32, 16>}, {pipeline_mode = #tpu.pipeline_mode<synchronous>, transform_indices = @transform_2, window_bounds = array<i64: 32, 1>}, {pipeline_mode = #tpu.pipeline_mode<synchronous>, transform_indices = @transform_3, window_bounds = array<i64: 32, 32>}, {pipeline_mode = #tpu.pipeline_mode<synchronous>, transform_indices = @transform_4, window_bounds = array<i64: 32, 1>}, {pipeline_mode = #tpu.pipeline_mode<synchronous>, transform_indices = @transform_5, window_bounds = array<i64: 8, 32>}, {pipeline_mode = #tpu.pipeline_mode<synchronous>, transform_indices = @transform_6, window_bounds = array<i64: 8, 16>}, {pipeline_mode = #tpu.pipeline_mode<synchronous>, transform_indices = @transform_7, window_bounds = array<i64: 8, 1>}, {transform_indices = @transform_8, window_bounds = array<i64: 8, 8>}]} {
    %c0 = arith.constant 0 : index
    %c0_0 = arith.constant 0 : index
    %0 = vector.load %arg1[%c0, %c0_0] : memref<16x8xf32, #tpu.memory_space<vmem>>, vector<16x8xf32>
    %c0_1 = arith.constant 0 : index
    %c0_2 = arith.constant 0 : index
    %1 = vector.load %arg2[%c0_1, %c0_2] : memref<32x16xf32, #tpu.memory_space<vmem>>, vector<32x16xf32>
    %cst = arith.constant dense<0.000000e+00> : vector<32x8xf32>
    %2 = tpu.matmul %1, %0, %cst {dimension_numbers = #tpu.dot_dimension_numbers<[1], [0], [0], [1], [0, 0, 1, 1], [], []>} : vector<32x16xf32>, vector<16x8xf32>, vector<32x8xf32> -> vector<32x8xf32>
    %c0_3 = arith.constant 0 : index
    %c0_4 = arith.constant 0 : index
    %3 = vector.load %arg3[%c0_3, %c0_4] : memref<32x1xf32, #tpu.memory_space<vmem>>, vector<32x1xf32>
    %4 = vector.broadcast %3 : vector<32x1xf32> to vector<32x8xf32>
    %5 = arith.addf %2, %4 : vector<32x8xf32>
    %cst_5 = arith.constant 0.000000e+00 : f32
    %6 = vector.broadcast %cst_5 : f32 to vector<32x8xf32>
    %7 = arith.maximumf %5, %6 : vector<32x8xf32>
    %c0_6 = arith.constant 0 : index
    %c0_7 = arith.constant 0 : index
    %8 = vector.load %arg4[%c0_6, %c0_7] : memref<32x32xf32, #tpu.memory_space<vmem>>, vector<32x32xf32>
    %cst_8 = arith.constant dense<0.000000e+00> : vector<32x8xf32>
    %9 = tpu.matmul %8, %7, %cst_8 {dimension_numbers = #tpu.dot_dimension_numbers<[1], [0], [0], [1], [0, 0, 1, 1], [], []>} : vector<32x32xf32>, vector<32x8xf32>, vector<32x8xf32> -> vector<32x8xf32>
    %c0_9 = arith.constant 0 : index
    %c0_10 = arith.constant 0 : index
    %10 = vector.load %arg5[%c0_9, %c0_10] : memref<32x1xf32, #tpu.memory_space<vmem>>, vector<32x1xf32>
    %11 = vector.broadcast %10 : vector<32x1xf32> to vector<32x8xf32>
    %12 = arith.addf %9, %11 : vector<32x8xf32>
    %cst_11 = arith.constant 0.000000e+00 : f32
    %13 = vector.broadcast %cst_11 : f32 to vector<32x8xf32>
    %14 = arith.maximumf %12, %13 : vector<32x8xf32>
    %c0_12 = arith.constant 0 : index
    %c0_13 = arith.constant 0 : index
    %15 = vector.load %arg6[%c0_12, %c0_13] : memref<8x32xf32, #tpu.memory_space<vmem>>, vector<8x32xf32>
    %cst_14 = arith.constant dense<0.000000e+00> : vector<8x8xf32>
    %16 = tpu.matmul %15, %14, %cst_14 {dimension_numbers = #tpu.dot_dimension_numbers<[1], [0], [0], [1], [0, 0, 1, 1], [], []>} : vector<8x32xf32>, vector<32x8xf32>, vector<8x8xf32> -> vector<8x8xf32>
    %c0_15 = arith.constant 0 : index
    %c0_16 = arith.constant 0 : index
    %17 = vector.load %arg7[%c0_15, %c0_16] : memref<8x16xf32, #tpu.memory_space<vmem>>, vector<8x16xf32>
    %cst_17 = arith.constant dense<0.000000e+00> : vector<8x8xf32>
    %18 = tpu.matmul %17, %0, %cst_17 {dimension_numbers = #tpu.dot_dimension_numbers<[1], [0], [0], [1], [0, 0, 1, 1], [], []>} : vector<8x16xf32>, vector<16x8xf32>, vector<8x8xf32> -> vector<8x8xf32>
    %19 = arith.addf %16, %18 : vector<8x8xf32>
    %c0_18 = arith.constant 0 : index
    %c0_19 = arith.constant 0 : index
    %20 = vector.load %arg8[%c0_18, %c0_19] : memref<8x1xf32, #tpu.memory_space<vmem>>, vector<8x1xf32>
    %21 = vector.broadcast %20 : vector<8x1xf32> to vector<8x8xf32>
    %22 = arith.addf %19, %21 : vector<8x8xf32>
    %c0_20 = arith.constant 0 : index
    %c0_21 = arith.constant 0 : index
    %23 = vector.load %arg9[%c0_20, %c0_21] : memref<8x8xf32, #tpu.memory_space<vmem>>, vector<8x8xf32>
    tpu.vector_store %arg9[%c0_20, %c0_21], %22 {strides = array<i32>} : memref<8x8xf32, #tpu.memory_space<vmem>>, vector<8x8xf32>,
    return
  }
  func.func @transform_0(%arg0: i32) -> (i32, i32) {
    %c0_i32 = arith.constant 0 : i32
    %c0_i32_0 = arith.constant 0 : i32
    return %c0_i32, %arg0 : i32, i32
  }
  func.func @transform_1(%arg0: i32) -> (i32, i32) {
    %c0_i32 = arith.constant 0 : i32
    %c0_i32_0 = arith.constant 0 : i32
    %c0_i32_1 = arith.constant 0 : i32
    return %c0_i32, %c0_i32_0 : i32, i32
  }
  func.func @transform_2(%arg0: i32) -> (i32, i32) {
    %c0_i32 = arith.constant 0 : i32
    %c0_i32_0 = arith.constant 0 : i32
    %c0_i32_1 = arith.constant 0 : i32
    return %c0_i32, %c0_i32_0 : i32, i32
  }
  func.func @transform_3(%arg0: i32) -> (i32, i32) {
    %c0_i32 = arith.constant 0 : i32
    %c0_i32_0 = arith.constant 0 : i32
    %c0_i32_1 = arith.constant 0 : i32
    return %c0_i32, %c0_i32_0 : i32, i32
  }
  func.func @transform_4(%arg0: i32) -> (i32, i32) {
    %c0_i32 = arith.constant 0 : i32
    %c0_i32_0 = arith.constant 0 : i32
    %c0_i32_1 = arith.constant 0 : i32
    return %c0_i32, %c0_i32_0 : i32, i32
  }
  func.func @transform_5(%arg0: i32) -> (i32, i32) {
    %c0_i32 = arith.constant 0 : i32
    %c0_i32_0 = arith.constant 0 : i32
    %c0_i32_1 = arith.constant 0 : i32
    return %c0_i32, %c0_i32_0 : i32, i32
  }
  func.func @transform_6(%arg0: i32) -> (i32, i32) {
    %c0_i32 = arith.constant 0 : i32
    %c0_i32_0 = arith.constant 0 : i32
    %c0_i32_1 = arith.constant 0 : i32
    return %c0_i32, %c0_i32_0 : i32, i32
  }
  func.func @transform_7(%arg0: i32) -> (i32, i32) {
    %c0_i32 = arith.constant 0 : i32
    %c0_i32_0 = arith.constant 0 : i32
    %c0_i32_1 = arith.constant 0 : i32
    return %c0_i32, %c0_i32_0 : i32, i32
  }
  func.func @transform_8(%arg0: i32) -> (i32, i32) {
    %c0_i32 = arith.constant 0 : i32
    %c0_i32_0 = arith.constant 0 : i32
    return %c0_i32, %arg0 : i32, i32
  }
}

</mosaic_0001>

<bundles_post_ra>
// kernel: tpu_custom_call.1
= control target key start
LH: loop header
LB: loop body
LE: loop exit
PB: predicated region body
PF: predicated region fallthrough
CT: control target
= control target key end

     0   :  { %vm60_vm0 = vcmask 130048   ;;  %v565_v4 = vmov 0   ;;  %s700_s0 = inlined_call_operand.vmem [shape: f32[16,8], index: 0, kind: input, shape index: {}]   ;;  %s701_s1 = inlined_call_operand.vmem [shape: f32[32,16], index: 1, kind: input, shape index: {}]   ;;  %s702_s2 = inlined_call_operand.vmem [shape: f32[32,1], index: 2, kind: input, shape index: {}]   ;;  %s703_s3 = inlined_call_operand.vmem [shape: f32[32,32], index: 3, kind: input, shape index: {}]   ;;  %s704_s4 = inlined_call_operand.vmem [shape: f32[32,1], index: 4, kind: input, shape index: {}]   ;;  %s705_s5 = inlined_call_operand.vmem [shape: f32[8,32], index: 5, kind: input, shape index: {}]   ;;  %s706_s6 = inlined_call_operand.vmem [shape: f32[8,16], index: 6, kind: input, shape index: {}]   ;;  %s707_s7 = inlined_call_operand.vmem [shape: f32[8,1], index: 7, kind: input, shape index: {}]   ;;  %s708_s8 = inlined_call_operand.hbm [shape: f32[8,8], index: 8, kind: output, shape index: {}]  }
   0x1   :  { %v617_v0 = vld [vmem:[%s700_s0 + $0x8] sm:$0xff]  ;;  %v622_v1 = vld [vmem:[%s700_s0] sm:$0xff]  ;;  %541 = vset.pattern.permute.xlu0 %v565_v4  ;;  %v39_v5 = vld [vmem:[%s702_s2 + $0x18] sm:$0xff]  ;;  %542 = vset.pattern.permute.xlu1 %v565_v4 }
   0x2   :  { %v32_v2 = vld [vmem:[%s701_s1] sm:$0xff]  ;;  %495 = vmatprep.subr.mxu0 %v617_v0  ;;  %v33_v3 = vld [vmem:[%s701_s1 + $0x8] sm:$0xff]  ;;  %v34_v6 = vld [vmem:[%s701_s1 + $0x10] sm:$0xff]  ;;  %57 = vperm.xlu0 %541, %v39_v5  }
   0x3   :  { %499 = vmatprep.mubr.msk.f32.mxu0 %vm60_vm0, %v32_v2  ;;  %496 = vmatpush3.msra.mxu0 %v617_v0  ;;  %v37_v7 = vld [vmem:[%s702_s2 + $0x8] sm:$0xff]  ;;  %v38_v8 = vld [vmem:[%s702_s2 + $0x10] sm:$0xff] }
   0x4   :  { %497 = vmatprep.subr.mxu0 %v622_v1  ;;  %47 = vperm.xlu1 %542, %v37_v7  }
   0x5   :  { %498 = vmatpush3.msra.mxu0 %v622_v1 }
   0x6   :  { %500 = vmatmul.mubr.msk.f32.vlgmr.msra.gmra.mxu0 %vm60_vm0, %v33_v3 }
   0x7   :  { %13 = vsyncpa [#allocation3], 0  ;;  %502 = vmatprep.mubr.msk.f32.mxu0 %vm60_vm0, %v34_v6  ;;  %v35_v9 = vld [vmem:[%s701_s1 + $0x18] sm:$0xff]  ;;  %v36_v10 = vld [vmem:[%s702_s2] sm:$0xff]  ;;  %52 = vperm.xlu0 %541, %v38_v8   ;;  %vm190_vm1 = vcmask 261120   ;;  %v566_v36 = vmov 0.0  }
   0x8   :  { %v169_v11 = vld [vmem:[%s704_s4 + $0x18] sm:$0xff]  ;;  %42 = vperm.xlu1 %542, %v36_v10   ;;  %v168_v12 = vld [vmem:[%s704_s4 + $0x10] sm:$0xff]  ;;  %v167_v13 = vld [vmem:[%s704_s4 + $0x8] sm:$0xff]  ;;  %519 = vmatprep.subr.mxu0 %v566_v36  ;;  %vm567_vm2 = vmmov 0   ;;  %s568_s17 = smov [#allocation2]   ;;  %vm447_vm3 = vcmask 64512  }
   0x9   :  { %v166_v14 = vld [vmem:[%s704_s4] sm:$0xff]  ;;  %v163_v33 = vld [vmem:[%s703_s3 + $0x8] sm:$0xff]  ;;  %v164_v34 = vld [vmem:[%s703_s3 + $0x10] sm:$0xff]  ;;  %520 = vmatpush3.msra.mxu0 %v617_v0  ;;  %s455_s18 = sshll.u32 %s568_s17, 4  ;;  %s456_s18 = int_to_ptr.vmem [resolvable:$true] %s455_s18 }
   0xa   :  { %503 = vmatmul.mubr.msk.f32.gmra.mxu0 %vm60_vm0, %v35_v9  ;;  %v440_v15 = vld [vmem:[%s707_s7] sm:$0xff]  ;;  %v165_v35 = vld [vmem:[%s703_s3 + $0x18] sm:$0xff]  ;;  %521 = vmatprep.subr.mxu0 %v566_v36  ;;  %s543_s19 = scalar_lea.vmem %s456_s18, 128  ;;  %p548_p1 = scmp.lt.s32.totalorder %s456_s18, %s456_s18 }
   0xb   :  { %187 = vperm.xlu0 %541, %v169_v11   ;;  %v162_v16 = vld [vmem:[%s703_s3] sm:$0xff]  ;;  %522 = vmatpush3.msra.mxu0 %v622_v1  ;;  %p544_p0 = scmp.ne.s32.totalorder %s456_s18, %s543_s19  ;;  %p549_p2 = scmp.lt.s32.totalorder %s543_s19, %s543_s19 }
   0xc   :  { %182 = vperm.xlu1 %542, %v168_v12   ;;  %513 = vmatprep.mubr.msk.f32.mxu1 %vm190_vm1, %v162_v16  ;;  %v293_v37 = vld [vmem:[%s706_s6] sm:$0xff] }
   0xd   :  { %523 = vmatprep.mubr.msk.f32.mxu0 %vm567_vm2, %v566_v36  ;;  %v292_v54 = vld [vmem:[%s705_s5] sm:$0xff]  ;;  %p550_p3 = por %p549_p2, %p548_p1 }
   0xe   :  { %524 = vmatmul.mubr.msk.f32.vlgmr.msra.gmra.mxu0 %vm60_vm0, %v293_v37 }
   0xf   :  { %177 = vperm.xlu0 %541, %v167_v13   ;;  %p551_p4 = pnand %p550_p3, %p544_p0 }
  0x10   :  { %172 = vperm.xlu1 %542, %v166_v14  }
  0x13   :  { %443 = vperm.xlu0 %541, %v440_v15  }
  0x7d   :  { %v58_v17 = vpop.permute.xlu0 %57 }
  0x7f   :  { %v48_v19 = vpop.permute.xlu1 %47 }
  0x82   :  { %v53_v23 = vpop.permute.xlu0 %52 }
  0x83   :  { %v43_v28 = vpop.permute.xlu1 %42 }
  0x86   :  { %v188_v38 = vpop.permute.xlu0 %187 }
  0x87   :  { %v183_v40 = vpop.permute.xlu1 %182 }
  0x8a   :  { %v178_v44 = vpop.permute.xlu0 %177 }
  0x8b   :  { %v173_v49 = vpop.permute.xlu1 %172 }
  0x8e   :  { %v444_v59 = vpop.permute.xlu0 %443 }
  0xc6   :  { %v501_v18 = vpop.f32.mrf.mxu0 }
  0xc7   :  { %v145_v25 = vadd.f32 %v501_v18, %v48_v19 }
  0xc8   :  { %v139_v20 = vpop.f32.mrf.mxu0 }
  0xc9   :  { %v140_v29 = vadd.f32 %v139_v20, %v43_v28  ;;  %v159_v31 = vmax.f32 %v145_v25, 0.0 }
  0xca   :  { %v504_v21 = vpop.f32.mrf.mxu0 }
  0xcb   :  { %v155_v22 = vadd.f32 %v504_v21, %v58_v17  ;;  %v158_v32 = vmax.f32 %v140_v29, 0.0 }
  0xcc   :  { %v149_v24 = vpop.f32.mrf.mxu0 }
  0xcd   :  { %v161_v26 = vmax.f32 %v155_v22, 0.0  ;;  %v150_v27 = vadd.f32 %v149_v24, %v53_v23 }
  0xce   :  { %v363_v55 = vpop.f32.mrf.mxu0 }
  0xcf   :  { %v160_v30 = vmax.f32 %v150_v27, 0.0  ;;  %505 = vmatprep.subr.mxu1 %v161_v26 }
  0xd0   :  { %506 = vmatpush3.msra.mxu1 %v161_v26  ;;  %v525_v56 = vpop.f32.mrf.mxu0 }
  0xd1   :  { %507 = vmatprep.subr.mxu1 %v160_v30 }
  0xd2   :  { %508 = vmatpush3.msra.mxu1 %v160_v30 }
  0xd3   :  { %509 = vmatprep.subr.mxu1 %v159_v31 }
  0xd4   :  { %510 = vmatpush3.msra.mxu1 %v159_v31 }
  0xd5   :  { %511 = vmatprep.subr.mxu1 %v158_v32 }
  0xd6   :  { %512 = vmatpush3.msra.mxu1 %v158_v32 }
  0xd7   :  { %514 = vmatmul.mubr.msk.f32.vlgmr.msra.gmra.mxu1 %vm190_vm1, %v163_v33  ;;  %526 = vmatprep.subr.mxu1 %v566_v36 }
  0xd8   :  { %516 = vmatprep.mubr.msk.f32.mxu1 %vm190_vm1, %v164_v34 }
  0xdb   :  { %517 = vmatmul.mubr.msk.f32.gmra.mxu1 %vm190_vm1, %v165_v35 }
  0xdc   :  { %534 = vmatprep.mubr.msk.f32.mxu1 %vm567_vm2, %v566_v36 }
 0x197   :  { %v515_v39 = vpop.f32.mrf.mxu1 }
 0x198   :  { %v275_v46 = vadd.f32 %v515_v39, %v178_v44 }
 0x199   :  { %v269_v41 = vpop.f32.mrf.mxu1 }
 0x19a   :  { %v270_v50 = vadd.f32 %v269_v41, %v173_v49  ;;  %v289_v52 = vmax.f32 %v275_v46, 0.0 }
 0x19b   :  { %v518_v42 = vpop.f32.mrf.mxu1 }
 0x19c   :  { %v285_v43 = vadd.f32 %v518_v42, %v188_v38  ;;  %v288_v53 = vmax.f32 %v270_v50, 0.0 }
 0x19d   :  { %v279_v45 = vpop.f32.mrf.mxu1 }
 0x19e   :  { %v291_v47 = vmax.f32 %v285_v43, 0.0  ;;  %v280_v48 = vadd.f32 %v279_v45, %v183_v40 }
 0x1a0   :  { %v290_v51 = vmax.f32 %v280_v48, 0.0  ;;  %527 = vmatpush3.msra.mxu1 %v291_v47 }
 0x1a1   :  { %528 = vmatprep.subr.mxu1 %v566_v36 }
 0x1a2   :  { %529 = vmatpush3.msra.mxu1 %v290_v51 }
 0x1a3   :  { %530 = vmatprep.subr.mxu1 %v566_v36 }
 0x1a4   :  { %531 = vmatpush3.msra.mxu1 %v289_v52 }
 0x1a5   :  { %532 = vmatprep.subr.mxu1 %v566_v36 }
 0x1a6   :  { %533 = vmatpush3.msra.mxu1 %v288_v53 }
 0x1a7   :  { %535 = vmatmul.mubr.msk.f32.vlgmr.msra.gmra.mxu1 %vm190_vm1, %v292_v54 }
 0x267   :  { %v436_v57 = vpop.f32.mrf.mxu1 }
 0x268   :  { %v437_v58 = vadd.f32 %v436_v57, %v363_v55 }
 0x269   :  { %v536_v60 = vpop.f32.mrf.mxu1 }
 0x26a   :  { %v446_v61 = vadd.f32 %v444_v59, %v437_v58 }
 0x26c   :  { %448 = vst.msk [vmem:[#allocation2] sm:$0xff] %vm447_vm3, %v446_v61 }
 0x26d   :  { %554 = shalt.err (!%p551_p4)
}
 0x26e   :  { %458 = dma.vmem_to_hbm [thread:$0]  %s456_s18, 128, %s708_s8, [#allocation3]  }
 0x26f   :  { %563 = dma.done.wait [#allocation3], 128  }
 0x270   :  { %564 = vsyncadd [#allocation3], 4294967168 }
 0x271   :  { %462 = vsyncpa [#allocation3], 1 }

</bundles_post_ra>
